<compile_context>
chip_gen: v5e
topology: v5e:2x2
jax: 0.10.0
libtpu: 0.0.40
codegen_flags: <defaults>
</compile_context>

<pallas_src>
import functools

import jax
import jax.numpy as jnp
import numpy as np
from jax import lax
from jax.experimental import pallas as pl
from jax.experimental.pallas import tpu as pltpu


# ---------------------------------------------------------------------------
# VMEM / tiling helpers (generation-aware, lane-padding-aware).
# ---------------------------------------------------------------------------

def _vmem_limit_bytes():
    """Scoped-VMEM limit to request, derived from the chip's physical VMEM."""
    cap = 64 * 1024 * 1024  # conservative default (v7x physical VMEM)
    try:
        info = pltpu.get_tpu_info()
        cap = int(getattr(info, "vmem_capacity_bytes", cap) or cap)
    except Exception:
        pass
    # v7x (64 MiB) -> 48 MiB limit; v5e/v6e (128 MiB) -> 96 MiB limit.
    return int(min((cap * 3) // 4, 96 * 1024 * 1024))


def _padded_vmem_bytes(rows, cols, dtype):
    """Real VMEM footprint of a (rows, cols) tile after (sublane, 128) padding."""
    itemsize = np.dtype(dtype).itemsize
    sublane = max(8, 32 // itemsize)          # 8 for f32, 16 for bf16, 32 for i8
    r = -(-rows // sublane) * sublane
    c = -(-cols // 128) * 128
    return r * c * itemsize


def _pick_group(bh, q_steps, slice_io_db_bytes, slice_scratch_bytes, budget):
    """Largest divisor of bh that fits the VMEM budget and keeps >= 2 parallel
    grid steps (megacore on v7x) whenever that is possible."""
    best = 1
    for g in range(1, bh + 1):
        if bh % g:
            continue
        if g * (slice_io_db_bytes + slice_scratch_bytes) > budget:
            continue
        if g > 1 and (bh // g) * q_steps < 2:
            continue
        best = g
    return best


def _select_tiling(seq, head_dim, bh, in_dtype, out_dtype, budget_bytes):
    """Pick (tq, tk, g): largest lane-dense tiles + BH group that fit VMEM."""
    cands = [t for t in (512, 384, 256, 128) if seq % t == 0] or [seq]
    for t in cands:
        io = (3 * _padded_vmem_bytes(t, head_dim, in_dtype)            # q, k, v
              + _padded_vmem_bytes(t, head_dim, out_dtype))            # o
        scratch = (2 * _padded_vmem_bytes(t, 1, jnp.float32)           # m, l
                   + _padded_vmem_bytes(t, head_dim, jnp.float32)      # acc
                   + 2 * _padded_vmem_bytes(t, t, jnp.float32))        # s, p
        if 2 * io + scratch <= budget_bytes:                           # double-buffered IO
            g = _pick_group(bh, max(1, seq // t), 2 * io, scratch, budget_bytes)
            return t, t, g
    # TODO(synk): very long sequences not divisible by 128 fall through to a
    # full-extent tile; pad the sequence to a multiple of 128 in that case.
    t = cands[-1]
    return t, t, 1


# ---------------------------------------------------------------------------
# Fused attention kernel: softmax(q @ k^T * scale) @ v   per (batch*head).
# ---------------------------------------------------------------------------

def _flash_attn_kernel(q_ref, k_ref, v_ref, o_ref, m_sc, l_sc, acc_sc, *, scale):
    # q_ref: (G, TQ, D), k_ref/v_ref: (G, TK, D), o_ref: (G, TQ, D)
    kv = pl.program_id(2)

    @pl.when(kv == 0)
    def _():
        m_sc[...] = jnp.full_like(m_sc, -jnp.inf)
        l_sc[...] = jnp.zeros_like(l_sc)
        acc_sc[...] = jnp.zeros_like(acc_sc)

    # Scores: contraction over the last (lane) dim of q and k -> MXU,
    # f32 accumulation, no materialized transpose.
    s = lax.dot_general(
        q_ref[...], k_ref[...],
        dimension_numbers=(((2,), (2,)), ((0,), (0,))),
        preferred_element_type=jnp.float32,
    ) * scale

    m_prev = m_sc[...]
    m_new = jnp.maximum(m_prev, s.max(axis=-1, keepdims=True))
    alpha = jnp.exp(m_prev - m_new)
    p = jnp.exp(s - m_new)
    l_sc[...] = alpha * l_sc[...] + p.sum(axis=-1, keepdims=True)

    pv = lax.dot_general(
        p.astype(v_ref.dtype), v_ref[...],
        dimension_numbers=(((2,), (1,)), ((0,), (0,))),
        preferred_element_type=jnp.float32,
    )
    acc_sc[...] = alpha * acc_sc[...] + pv
    m_sc[...] = m_new

    @pl.when(kv == pl.num_programs(2) - 1)
    def _():
        o_ref[...] = (acc_sc[...] / l_sc[...]).astype(o_ref.dtype)


def fused_attention(q, k, v, *, scale):
    """softmax(q @ k^T * scale) @ v for q,k,v of shape (B, H, S, D).

    Replaces Attention's matmul1 -> *scale -> Softmax -> matmul2 chain; the
    S x S score tensor never touches HBM (review item #1).
    """
    B, H, S, D = q.shape
    assert k.shape == (B, H, S, D) and v.shape == (B, H, S, D)

    BH = B * H
    qf = q.reshape(BH, S, D)
    kf = k.reshape(BH, S, D)
    vf = v.reshape(BH, S, D)

    vmem_limit = _vmem_limit_bytes()
    budget = vmem_limit // 2  # headroom for compiler scratch / spills
    tq, tk, g = _select_tiling(S, D, BH, q.dtype, q.dtype, budget)

    grid = (BH // g, S // tq, S // tk)

    out = pl.pallas_call(
        functools.partial(_flash_attn_kernel, scale=scale),
        out_shape=jax.ShapeDtypeStruct((BH, S, D), q.dtype),
        grid_spec=pltpu.PrefetchScalarGridSpec(
            num_scalar_prefetch=0,
            grid=grid,
            in_specs=[
                pl.BlockSpec((g, tq, D), lambda gi, qi, ki: (gi, qi, 0)),
                pl.BlockSpec((g, tk, D), lambda gi, qi, ki: (gi, ki, 0)),
                pl.BlockSpec((g, tk, D), lambda gi, qi, ki: (gi, ki, 0)),
            ],
            out_specs=pl.BlockSpec((g, tq, D), lambda gi, qi, ki: (gi, qi, 0)),
            scratch_shapes=[
                pltpu.VMEM((g, tq, 1), jnp.float32),   # running max
                pltpu.VMEM((g, tq, 1), jnp.float32),   # running denom
                pltpu.VMEM((g, tq, D), jnp.float32),   # output accumulator
            ],
        ),
        compiler_params=pltpu.CompilerParams(
            dimension_semantics=("parallel", "parallel", "arbitrary"),
            vmem_limit_bytes=vmem_limit,
        ),
    )(qf, kf, vf)

    return out.reshape(B, H, S, D)


def attention_reference(q, k, v, scale):
    dots = jnp.einsum("bhid,bhjd->bhij", q, k,
                      preferred_element_type=jnp.float32) * scale
    attn = jax.nn.softmax(dots, axis=-1)
    out = jnp.einsum("bhij,bhjd->bhid", attn.astype(v.dtype), v,
                     preferred_element_type=jnp.float32)
    return out.astype(q.dtype)


# ---------------------------------------------------------------------------
# Full classifier forward (plain JAX around the fused Pallas attention).
# TODO(synk): Conv1d / LayerNorm / MLP / classifier Linear / max-aggregate are
# left to XLA; only the attention core is a dedicated Pallas kernel.
# ---------------------------------------------------------------------------

def _linear(x, w, b=None):
    y = x @ w.T
    return y if b is None else y + b


def _layer_norm(x, gamma, beta, eps=1e-5):
    mu = x.mean(-1, keepdims=True)
    var = ((x - mu) ** 2).mean(-1, keepdims=True)
    return (x - mu) * lax.rsqrt(var + eps) * gamma + beta


def attention_forward(x, p, num_heads, use_pallas=True):
    B, N, C = x.shape
    D = C // num_heads
    qkv = _linear(x, p["qkv_w"], p["qkv_b"])                      # (B, N, 3C)
    qkv = qkv.reshape(B, N, 3, num_heads, D)                      # 'b n (qkv h d)'
    qkv = jnp.transpose(qkv, (2, 0, 3, 1, 4))                     # (3, B, H, N, D)
    q, k, v = qkv[0], qkv[1], qkv[2]
    scale = D ** (-0.5)
    if use_pallas:
        out = fused_attention(q, k, v, scale=scale)
    else:
        out = attention_reference(q, k, v, scale)
    out = jnp.transpose(out, (0, 2, 1, 3)).reshape(B, N, C)       # 'b h n d -> b n (h d)'
    return _linear(out, p["proj_w"], p["proj_b"])


def block_forward(x, p, num_heads, use_pallas=True):
    x = _layer_norm(x + attention_forward(x, p["attn"], num_heads, use_pallas),
                    p["norm1_g"], p["norm1_b"])
    h = _linear(x, p["fc1_w"], p["fc1_b"])
    h = jax.nn.gelu(h, approximate=False)                         # nn.GELU (exact)
    h = _linear(h, p["fc2_w"], p["fc2_b"])
    x = _layer_norm(x + h, p["norm2_g"], p["norm2_b"])
    return x


def classifier_forward(spectra, params, *, num_heads, stride, use_pallas=True):
    # BandEncoding: concat reflectance with normalized band wavelengths.
    banddef = params["banddef"]                                   # (S_bands,)
    x = jnp.stack([spectra, jnp.broadcast_to(banddef, spectra.shape)], axis=-1)
    x = jnp.transpose(x, (0, 2, 1))                               # (B, 2, S_bands)
    x = lax.conv_general_dilated(x, params["conv_w"], window_strides=(stride,),
                                 padding="VALID",
                                 dimension_numbers=("NCH", "OIH", "NCH"))
    x = x + params["conv_b"][None, :, None]
    x = jnp.tanh(x)
    x = jnp.transpose(x, (0, 2, 1))                               # (B, n_conv, dim_proj)
    x = block_forward(x, params["block"], num_heads, use_pallas)  # n_layers = 1
    x = x.max(axis=1)                                             # agg = 'max'
    return _linear(x, params["cls_w"], params["cls_b"])


def init_classifier_params(key, *, n_bands, dim_proj, dim_ff, n_classes, ker_proj):
    # TODO(synk): banddef.npy and the load_model_weights checkpoint cannot be
    # read in-script; use a deterministic synthetic banddef and random weights.
    ks = jax.random.split(key, 6)

    def dense(k, out_f, in_f):
        return jax.random.normal(k, (out_f, in_f), jnp.float32) / jnp.sqrt(float(in_f))

    banddef = jnp.linspace(400.0, 2500.0, n_bands, dtype=jnp.float32)
    banddef = (banddef - banddef.mean()) / banddef.std()
    return {
        "banddef": banddef,
        "conv_w": jax.random.normal(ks[0], (dim_proj, 2, ker_proj), jnp.float32) * 0.2,
        "conv_b": jnp.zeros((dim_proj,), jnp.float32),
        "block": {
            "norm1_g": jnp.ones((dim_proj,), jnp.float32),
            "norm1_b": jnp.zeros((dim_proj,), jnp.float32),
            "norm2_g": jnp.ones((dim_proj,), jnp.float32),
            "norm2_b": jnp.zeros((dim_proj,), jnp.float32),
            "attn": {
                "qkv_w": dense(ks[1], 3 * dim_proj, dim_proj),
                "qkv_b": jnp.zeros((3 * dim_proj,), jnp.float32),
                "proj_w": dense(ks[2], dim_proj, dim_proj),
                "proj_b": jnp.zeros((dim_proj,), jnp.float32),
            },
            "fc1_w": dense(ks[3], dim_ff, dim_proj),
            "fc1_b": jnp.zeros((dim_ff,), jnp.float32),
            "fc2_w": dense(ks[4], dim_proj, dim_ff),
            "fc2_b": jnp.zeros((dim_proj,), jnp.float32),
        },
        "cls_w": dense(ks[5], n_classes, dim_proj),
        "cls_b": jnp.zeros((n_classes,), jnp.float32),
    }


if __name__ == "__main__":
    key = jax.random.PRNGKey(0)
    k_params, k_spec, kq, kk, kv = jax.random.split(key, 5)

    # Small hyper-params consistent with the module's forward.
    B = 2
    n_bands = 37                      # conv output length: (37 - 9)//4 + 1 = 8
    dim_proj, n_heads, dim_ff, n_classes = 32, 4, 64, 3
    ker_proj, str_proj = 9, 4

    # (1) Standalone fused-attention kernel vs a pure-JAX reference.
    H, S, D = 4, 16, 32
    q = jax.random.normal(kq, (B, H, S, D), jnp.float32)
    k = jax.random.normal(kk, (B, H, S, D), jnp.float32)
    v = jax.random.normal(kv, (B, H, S, D), jnp.float32)
    scale = D ** (-0.5)
    out = jax.block_until_ready(fused_attention(q, k, v, scale=scale))
    ref = attention_reference(q, k, v, scale)
    assert out.shape == (B, H, S, D) and out.dtype == jnp.float32
    assert jnp.allclose(out, ref, atol=2e-2, rtol=2e-2), \
        float(jnp.max(jnp.abs(out - ref)))

    # (2) Full classifier forward with the fused Pallas attention inside.
    params = init_classifier_params(k_params, n_bands=n_bands, dim_proj=dim_proj,
                                    dim_ff=dim_ff, n_classes=n_classes,
                                    ker_proj=ker_proj)
    spectra = jax.random.normal(k_spec, (B, n_bands), jnp.float32)
    logits = jax.block_until_ready(
        classifier_forward(spectra, params, num_heads=n_heads, stride=str_proj,
                           use_pallas=True))
    ref_logits = classifier_forward(spectra, params, num_heads=n_heads,
                                    stride=str_proj, use_pallas=False)
    assert logits.shape == (B, n_classes)
    assert bool(jnp.all(jnp.isfinite(logits)))
    assert jnp.allclose(logits, ref_logits, atol=2e-2, rtol=2e-2), \
        float(jnp.max(jnp.abs(logits - ref_logits)))

    print("KERNEL_OK")
</pallas_src>

<mosaic_0001>
module attributes {stable_mosaic.version = 11 : i64} {
  func.func @_flash_attn_kernel(%arg0: i32, %arg1: i32, %arg2: i32, %arg3: memref<4x16x32xf32, #tpu.memory_space<vmem>>, %arg4: memref<4x16x32xf32, #tpu.memory_space<vmem>>, %arg5: memref<4x16x32xf32, #tpu.memory_space<vmem>>, %arg6: memref<4x16x32xf32, #tpu.memory_space<vmem>>, %arg7: memref<4x16x1xf32, #tpu.memory_space<vmem>>, %arg8: memref<4x16x1xf32, #tpu.memory_space<vmem>>, %arg9: memref<4x16x32xf32, #tpu.memory_space<vmem>>) attributes {dimension_semantics = [#tpu.dimension_semantics<parallel>, #tpu.dimension_semantics<parallel>, #tpu.dimension_semantics<arbitrary>], iteration_bounds = array<i64: 2, 1, 1>, scalar_prefetch = 0 : i64, scratch_operands = 3 : i64, tpu.core_type = #tpu.core_type<tc>, window_params = [{transform_indices = @transform_0, window_bounds = array<i64: 4, 16, 32>}, {transform_indices = @transform_1, window_bounds = array<i64: 4, 16, 32>}, {transform_indices = @transform_2, window_bounds = array<i64: 4, 16, 32>}, {transform_indices = @transform_3, window_bounds = array<i64: 4, 16, 32>}]} {
    %c0_i32 = arith.constant 0 : i32
    %0 = arith.cmpi eq, %arg2, %c0_i32 : i32
    %1 = arith.extui %0 : i1 to i32
    %c0_i32_0 = arith.constant 0 : i32
    %2 = arith.cmpi ne, %1, %c0_i32_0 : i32
    scf.if %2 {
      %cst_33 = arith.constant 0xFF800000 : f32
      %34 = vector.broadcast %cst_33 : f32 to vector<4x16x1xf32>
      %c0_34 = arith.constant 0 : index
      %c0_35 = arith.constant 0 : index
      %c0_36 = arith.constant 0 : index
      %35 = vector.load %arg7[%c0_34, %c0_35, %c0_36] : memref<4x16x1xf32, #tpu.memory_space<vmem>>, vector<4x16x1xf32>
      tpu.vector_store %arg7[%c0_34, %c0_35, %c0_36], %34 {strides = array<i32>} : memref<4x16x1xf32, #tpu.memory_space<vmem>>, vector<4x16x1xf32>,
      %cst_37 = arith.constant 0.000000e+00 : f32
      %36 = vector.broadcast %cst_37 : f32 to vector<4x16x1xf32>
      %c0_38 = arith.constant 0 : index
      %c0_39 = arith.constant 0 : index
      %c0_40 = arith.constant 0 : index
      %37 = vector.load %arg8[%c0_38, %c0_39, %c0_40] : memref<4x16x1xf32, #tpu.memory_space<vmem>>, vector<4x16x1xf32>
      tpu.vector_store %arg8[%c0_38, %c0_39, %c0_40], %36 {strides = array<i32>} : memref<4x16x1xf32, #tpu.memory_space<vmem>>, vector<4x16x1xf32>,
      %cst_41 = arith.constant 0.000000e+00 : f32
      %38 = vector.broadcast %cst_41 : f32 to vector<4x16x32xf32>
      %c0_42 = arith.constant 0 : index
      %c0_43 = arith.constant 0 : index
      %c0_44 = arith.constant 0 : index
      %39 = vector.load %arg9[%c0_42, %c0_43, %c0_44] : memref<4x16x32xf32, #tpu.memory_space<vmem>>, vector<4x16x32xf32>
      tpu.vector_store %arg9[%c0_42, %c0_43, %c0_44], %38 {strides = array<i32>} : memref<4x16x32xf32, #tpu.memory_space<vmem>>, vector<4x16x32xf32>,
    } else {
    }
    %c0 = arith.constant 0 : index
    %c0_1 = arith.constant 0 : index
    %c0_2 = arith.constant 0 : index
    %3 = vector.load %arg3[%c0, %c0_1, %c0_2] : memref<4x16x32xf32, #tpu.memory_space<vmem>>, vector<4x16x32xf32>
    %c0_3 = arith.constant 0 : index
    %c0_4 = arith.constant 0 : index
    %c0_5 = arith.constant 0 : index
    %4 = vector.load %arg4[%c0_3, %c0_4, %c0_5] : memref<4x16x32xf32, #tpu.memory_space<vmem>>, vector<4x16x32xf32>
    %cst = arith.constant dense<0.000000e+00> : vector<4x16x16xf32>
    %5 = tpu.matmul %3, %4, %cst {dimension_numbers = #tpu.dot_dimension_numbers<[2], [2], [1], [1], [0, 0, 0, 1, 1, 1], [0], [0]>} : vector<4x16x32xf32>, vector<4x16x32xf32>, vector<4x16x16xf32> -> vector<4x16x16xf32>
    %cst_6 = arith.constant 0.176776692 : f32
    %6 = vector.broadcast %cst_6 : f32 to vector<4x16x16xf32>
    %7 = arith.mulf %5, %6 : vector<4x16x16xf32>
    %c0_7 = arith.constant 0 : index
    %c0_8 = arith.constant 0 : index
    %c0_9 = arith.constant 0 : index
    %8 = vector.load %arg7[%c0_7, %c0_8, %c0_9] : memref<4x16x1xf32, #tpu.memory_space<vmem>>, vector<4x16x1xf32>
    %cst_10 = arith.constant dense<0xFF800000> : vector<4x16xf32>
    %9 = vector.multi_reduction <maximumf>, %7, %cst_10 [2] : vector<4x16x16xf32> to vector<4x16xf32>
    %10 = vector.shape_cast %9 : vector<4x16xf32> to vector<4x16x1xf32>
    %11 = arith.maximumf %8, %10 : vector<4x16x1xf32>
    %12 = arith.subf %8, %11 : vector<4x16x1xf32>
    %13 = math.exp %12 : vector<4x16x1xf32>
    %14 = vector.broadcast %11 : vector<4x16x1xf32> to vector<4x16x16xf32>
    %15 = arith.subf %7, %14 : vector<4x16x16xf32>
    %16 = math.exp %15 : vector<4x16x16xf32>
    %c0_11 = arith.constant 0 : index
    %c0_12 = arith.constant 0 : index
    %c0_13 = arith.constant 0 : index
    %17 = vector.load %arg8[%c0_11, %c0_12, %c0_13] : memref<4x16x1xf32, #tpu.memory_space<vmem>>, vector<4x16x1xf32>
    %18 = arith.mulf %13, %17 : vector<4x16x1xf32>
    %cst_14 = arith.constant dense<0.000000e+00> : vector<4x16xf32>
    %19 = vector.multi_reduction <add>, %16, %cst_14 [2] : vector<4x16x16xf32> to vector<4x16xf32>
    %20 = vector.shape_cast %19 : vector<4x16xf32> to vector<4x16x1xf32>
    %21 = arith.addf %18, %20 : vector<4x16x1xf32>
    %c0_15 = arith.constant 0 : index
    %c0_16 = arith.constant 0 : index
    %c0_17 = arith.constant 0 : index
    %22 = vector.load %arg8[%c0_15, %c0_16, %c0_17] : memref<4x16x1xf32, #tpu.memory_space<vmem>>, vector<4x16x1xf32>
    tpu.vector_store %arg8[%c0_15, %c0_16, %c0_17], %21 {strides = array<i32>} : memref<4x16x1xf32, #tpu.memory_space<vmem>>, vector<4x16x1xf32>,
    %c0_18 = arith.constant 0 : index
    %c0_19 = arith.constant 0 : index
    %c0_20 = arith.constant 0 : index
    %23 = vector.load %arg5[%c0_18, %c0_19, %c0_20] : memref<4x16x32xf32, #tpu.memory_space<vmem>>, vector<4x16x32xf32>
    %cst_21 = arith.constant dense<0.000000e+00> : vector<4x16x32xf32>
    %24 = tpu.matmul %16, %23, %cst_21 {dimension_numbers = #tpu.dot_dimension_numbers<[2], [1], [1], [2], [0, 0, 0, 1, 1, 2], [0], [0]>} : vector<4x16x16xf32>, vector<4x16x32xf32>, vector<4x16x32xf32> -> vector<4x16x32xf32>
    %c0_22 = arith.constant 0 : index
    %c0_23 = arith.constant 0 : index
    %c0_24 = arith.constant 0 : index
    %25 = vector.load %arg9[%c0_22, %c0_23, %c0_24] : memref<4x16x32xf32, #tpu.memory_space<vmem>>, vector<4x16x32xf32>
    %26 = vector.broadcast %13 : vector<4x16x1xf32> to vector<4x16x32xf32>
    %27 = arith.mulf %26, %25 : vector<4x16x32xf32>
    %28 = arith.addf %27, %24 : vector<4x16x32xf32>
    %c0_25 = arith.constant 0 : index
    %c0_26 = arith.constant 0 : index
    %c0_27 = arith.constant 0 : index
    %29 = vector.load %arg9[%c0_25, %c0_26, %c0_27] : memref<4x16x32xf32, #tpu.memory_space<vmem>>, vector<4x16x32xf32>
    tpu.vector_store %arg9[%c0_25, %c0_26, %c0_27], %28 {strides = array<i32>} : memref<4x16x32xf32, #tpu.memory_space<vmem>>, vector<4x16x32xf32>,
    %c0_28 = arith.constant 0 : index
    %c0_29 = arith.constant 0 : index
    %c0_30 = arith.constant 0 : index
    %30 = vector.load %arg7[%c0_28, %c0_29, %c0_30] : memref<4x16x1xf32, #tpu.memory_space<vmem>>, vector<4x16x1xf32>
    tpu.vector_store %arg7[%c0_28, %c0_29, %c0_30], %11 {strides = array<i32>} : memref<4x16x1xf32, #tpu.memory_space<vmem>>, vector<4x16x1xf32>,
    %c0_i32_31 = arith.constant 0 : i32
    %31 = arith.cmpi eq, %arg2, %c0_i32_31 : i32
    %32 = arith.extui %31 : i1 to i32
    %c0_i32_32 = arith.constant 0 : i32
    %33 = arith.cmpi ne, %32, %c0_i32_32 : i32
    scf.if %33 {
      %c0_33 = arith.constant 0 : index
      %c0_34 = arith.constant 0 : index
      %c0_35 = arith.constant 0 : index
      %34 = vector.load %arg9[%c0_33, %c0_34, %c0_35] : memref<4x16x32xf32, #tpu.memory_space<vmem>>, vector<4x16x32xf32>
      %c0_36 = arith.constant 0 : index
      %c0_37 = arith.constant 0 : index
      %c0_38 = arith.constant 0 : index
      %35 = vector.load %arg8[%c0_36, %c0_37, %c0_38] : memref<4x16x1xf32, #tpu.memory_space<vmem>>, vector<4x16x1xf32>
      %36 = vector.broadcast %35 : vector<4x16x1xf32> to vector<4x16x32xf32>
      %37 = arith.divf %34, %36 : vector<4x16x32xf32>
      %c0_39 = arith.constant 0 : index
      %c0_40 = arith.constant 0 : index
      %c0_41 = arith.constant 0 : index
      %38 = vector.load %arg6[%c0_39, %c0_40, %c0_41] : memref<4x16x32xf32, #tpu.memory_space<vmem>>, vector<4x16x32xf32>
      tpu.vector_store %arg6[%c0_39, %c0_40, %c0_41], %37 {strides = array<i32>} : memref<4x16x32xf32, #tpu.memory_space<vmem>>, vector<4x16x32xf32>,
    } else {
    }
    return
  }
  func.func @transform_0(%arg0: i32, %arg1: i32, %arg2: i32) -> (i32, i32, i32) {
    %c0_i32 = arith.constant 0 : i32
    %c0_i32_0 = arith.constant 0 : i32
    return %arg0, %arg1, %c0_i32 : i32, i32, i32
  }
  func.func @transform_1(%arg0: i32, %arg1: i32, %arg2: i32) -> (i32, i32, i32) {
    %c0_i32 = arith.constant 0 : i32
    %c0_i32_0 = arith.constant 0 : i32
    return %arg0, %arg2, %c0_i32 : i32, i32, i32
  }
  func.func @transform_2(%arg0: i32, %arg1: i32, %arg2: i32) -> (i32, i32, i32) {
    %c0_i32 = arith.constant 0 : i32
    %c0_i32_0 = arith.constant 0 : i32
    return %arg0, %arg2, %c0_i32 : i32, i32, i32
  }
  func.func @transform_3(%arg0: i32, %arg1: i32, %arg2: i32) -> (i32, i32, i32) {
    %c0_i32 = arith.constant 0 : i32
    %c0_i32_0 = arith.constant 0 : i32
    return %arg0, %arg1, %c0_i32 : i32, i32, i32
  }
}

</mosaic_0001>

<bundles_post_ra>
// kernel: tpu_custom_call.1
= control target key start
LH: loop header
LB: loop body
LE: loop exit
PB: predicated region body
PF: predicated region fallthrough
CT: control target
= control target key end

     0   :  { %s2029_s0 = inlined_call_operand.hbm [shape: f32[8,16,32], index: 0, kind: input, shape index: {}]   ;;  %s2030_s1 = inlined_call_operand.hbm [shape: f32[8,16,32], index: 1, kind: input, shape index: {}]   ;;  %s2031_s2 = inlined_call_operand.hbm [shape: f32[8,16,32], index: 2, kind: input, shape index: {}]   ;;  %s2032_s3 = inlined_call_operand.hbm [shape: f32[8,16,32], index: 3, kind: output, shape index: {}]  }
   0x1   :  { %2038 = sst [smem:[#allocation20_spill]] %s2030_s1 }
   0x2   :  { %8 = vsyncpa [#allocation6], 0 }
   0x3   :  { %10 = vsyncpa [#allocation6 + $0x1], 0 }
   0x4   :  { %11 = vsyncpa [#allocation9], 0 }
   0x5   :  { %13 = vsyncpa [#allocation9 + $0x1], 0 }
   0x6   :  { %14 = vsyncpa [#allocation7], 0 }
   0x7   :  { %16 = vsyncpa [#allocation7 + $0x1], 0  ;;  %s1640_s12 = smov 0   ;;  %s1642_s13 = smov 0  }
   0x8   :  { %s1644_s14 = smov 0   ;;  %s1646_s15 = smov 0  }
   0x9   :  { %s1648_s16 = smov 0   ;;  %s1650_s17 = smov 0  }
   0xa LB: > { %2039 = sst [smem:[#allocation15_spill]] %s1599_s14  ;;  %s1671_s18 = sadd.s32 4294967295, %s1611_s17   ;;  %s1611_s17 = sphi %s1650_s17, %s22_s17   ;;  %s1607_s16 = sphi %s1648_s16, %s2057_s16   ;;  %s1603_s15 = sphi %s1646_s15, %s2056_s15   ;;  %s1599_s14 = sphi %s1644_s14, %s2060_s14   ;;  %s1595_s13 = sphi %s1642_s13, %s2059_s13   ;;  %s1591_s12 = sphi %s1640_s12, %s2058_s12  }
   0xb   : > { %2040 = sst [smem:[#allocation16_spill]] %s1607_s16  ;;  %s1247_s19 = sadd.s32 4294967294, %s1611_s17  }
   0xc   : > { %2041 = sst [smem:[#allocation17_spill]] %s1611_s17  ;;  %s41_s20 = sadd.s32 1, %s1607_s16 }
   0xd   : > { %s50_s21 = sadd.s32 1, %s1599_s14  ;;  %p43_p0 = scmp.ge.s32.totalorder %s41_s20, 2 }
   0xe   : > { %p57_p1 = scmp.ne.s32.totalorder %s1599_s14, %s1595_s13  ;;  %p58_p2 = scmp.eq.s32.totalorder %s1611_s17, 0 }
   0xf   : > { %p63_p3 = scmp.ne.s32.totalorder %s1595_s13, %s1591_s12  ;;  %s2062_s20 = smov (%p43_p0, %s41_s20), 0 }
  0x10   : > { %2042 = sst [smem:[#allocation18_spill]] %s2062_s20  ;;  %p1683_p4 = por %p58_p2, %p57_p1 }
  0x11   : > { %p64_p5 = scmp.eq.s32.totalorder %s1671_s18, 0  ;;  %s45_s23 = ssub.s32 %s1607_s16, %s2062_s20 }
  0x12   : > { %p145_p6 = scmp.eq.s32.totalorder %s1671_s18, 1  ;;  %p48_p7 = scmp.eq.s32.totalorder %s45_s23, 0 }
  0x13   : > { %p1691_p8 = por %p64_p5, %p63_p3  ;;  %p151_p10 = scmp.eq.s32.totalorder %s1247_s19, 1 }
  0x14   : > { %p1695_p9 = por %p145_p6, %p57_p1  ;;  %p1249_p12 = scmp.ge.s32.totalorder %s1611_s17, 2 }
  0x15   : > { %s1700_s26 = scalar_select %p48_p7, %s1599_s14, %s50_s21  }
  0x16   : > { %p1702_p11 = por %p151_p10, %p63_p3  ;;  %p1327_p13 = scmp.lt.s32.totalorder %s1611_s17, 2 }
  0x17   : > { %2046 = sst [smem:[#allocation19_spill]] %s1700_s26  ;;  %s171_s28 = sand.u32 1, %s1599_s14  }
  0x18   : > { %s1709_s29 = sshll.u32 %s171_s28, 6  ;;  %s1298_s30 = sshll.u32 %s1607_s16, 6 }
  0x19   : > { %p1714_p0 = pnand %p1327_p13, %p1683_p4  ;;  %s196_s5 = sand.u32 1, %s1611_s17  }
  0x1a   : > { %s2049_s1 = sld [smem:[#allocation20_spill]]  ;;  %s200_s10 = scalar_lea.vmem [#allocation8], %s1709_s29 }
  0x1b   : > { %s211_s11 = sshll.u32 %s200_s10, 4  ;;  %s197_s19 = scalar_lea.sflag [#allocation9], %s196_s5  ;;  %s212_s11 = int_to_ptr.vmem [resolvable:$true] %s211_s11 }
  0x1c   : > { %s1613_s21 = smov 128   ;;  %s1614_s22 = smov 8  }
  0x1d   : > { %p1262_p1 = scmp.ge.s32.totalorder %s1611_s17, 1  ;;  %p244_p2 = scmp.lt.s32.totalorder %s1611_s17, 3 }
  0x1e   : > { %s172_s5 = scalar_lea.sflag [#allocation6], %s171_s28  ;;  %s233_s16 = scalar_lea.hbm %s2031_s2, %s1298_s30 }
  0x1f   : > { %p1727_p3 = pnand %p1262_p1, %p244_p2  ;;  %s234_s26 = sshll.u32 %s233_s16, 4  ;;  %s235_s26 = int_to_ptr.hbm [resolvable:$true] %s234_s26 }
  0x20   : > { %s208_s8 = scalar_lea.hbm %s2049_s1, %s1298_s30  ;;  %s175_s1 = scalar_lea.vmem [#allocation5], %s1709_s29 }
  0x21   : > { %s209_s9 = sshll.u32 %s208_s8, 4  ;;  %s183_s8 = scalar_lea.hbm %s2029_s0, %s1298_s30  ;;  %s210_s9 = int_to_ptr.hbm [resolvable:$true] %s209_s9 }
  0x22   : > { %1319 = dma.hbm_to_vmem [thread:$0]  (!%p1714_p0), %s210_s9, 1024, %s212_s11, %s197_s19, %s1613_s21, %s1613_s21, %s1614_s22  }
  0x23   : > { %s184_s10 = sshll.u32 %s183_s8, 4  ;;  %s186_s20 = sshll.u32 %s175_s1, 4  ;;  %s185_s10 = int_to_ptr.hbm [resolvable:$true] %s184_s10  ;;  %s187_s20 = int_to_ptr.vmem [resolvable:$true] %s186_s20 }
  0x24   : > { %1316 = dma.hbm_to_vmem [thread:$0]  (!%p1714_p0), %s185_s10, 1024, %s187_s20, %s172_s5, %s1613_s21, %s1613_s21, %s1614_s22  }
  0x25   : > { %s225_s14 = scalar_lea.vmem [#allocation10], %s1709_s29  ;;  %248 = sbr.rel (%p1727_p3) target bundleno = 732 (0x2dc), region = 32 }
  0x26   : > { %s236_s17 = sshll.u32 %s225_s14, 4  ;;  %s1746_s1 = sand.u32 (!%p1727_p3), 1, %s1595_s13   ;;  %s237_s17 = int_to_ptr.vmem [resolvable:$true] %s236_s17 }
  0x27   : > { %1322 = dma.hbm_to_vmem [thread:$0]  (!%p1714_p0), %s235_s26, 1024, %s237_s17, %s197_s19, %s1613_s21, %s1613_s21, %s1614_s22  }
  0x28   : > { %s1749_s20 = sshll.u32 (!%p1727_p3), %s1746_s1, 6  ;;  %s251_s28 = scalar_lea.sflag (!%p1727_p3), [#allocation6], %s1746_s1 }
  0x29   : > { %s1753_s16 = scalar_lea.vmem (!%p1727_p3), [#allocation5], %s1749_s20 }
  0x2a   : > { %1578 = dma.done.wait (%p1691_p8), %s251_s28, 1024  }
  0x2b   : > { %1580 = vsyncadd (%p1691_p8), %s251_s28, 4294966272  ;;  %s260_s14 = sand.u32 1, %s1671_s18   ;;  %s264_s26 = scalar_lea.vmem [#allocation8], %s1749_s20 }
  0x2c   : > { %s261_s17 = scalar_lea.sflag [#allocation9], %s260_s14 }
  0x2d   : > { %1582 = dma.done.wait (%p1691_p8), %s261_s17, 2048  }
  0x2e   : > { %1584 = vsyncadd (%p1691_p8), %s261_s17, 4294965248  ;;  %vm337_vm0 = vcmask 261120   ;;  %v355_v0 = vld [vmem:[%s264_s26 + $0x8] sm:$0xff]  ;;  %v354_v2 = vld [vmem:[%s264_s26] sm:$0xff]  ;;  %vm320_vm1 = vcmask 7168   ;;  %v1615_v16 = vmov -inf  }
  0x2f   : > { %v359_v1 = vld [vmem:[%s264_s26 + $0x28] sm:$0xff]  ;;  %1267 = vmatpush.xpose.msk.msra.mxu0 %vm337_vm0, %v355_v0  ;;  %v358_v3 = vld [vmem:[%s264_s26 + $0x20] sm:$0xff]  ;;  %v361_v4 = vld [vmem:[%s264_s26 + $0x38] sm:$0xff]  ;;  %321 = vst.msk [vmem:[#allocation2] sm:$0xff] %vm320_vm1, %v1615_v16  ;;  %vm519_vm2 = vcmask 130048   ;;  %v1616_v41 = vmov 0  }
  0x30   : > { %1275 = vmatpush.xpose.msk.msra.mxu2 %vm337_vm0, %v359_v1  ;;  %v357_v5 = vld [vmem:[%s264_s26 + $0x18] sm:$0xff]  ;;  %1279 = vmatpush.xpose.msk.msra.mxu3 %vm337_vm0, %v361_v4  ;;  %v360_v6 = vld [vmem:[%s264_s26 + $0x30] sm:$0xff]  ;;  %v346_v8 = vld [vmem:[%s1753_s16] sm:$0xff]  ;;  %322 = vst.msk [vmem:[#allocation2 + $0x8] sm:$0xff] %vm320_vm1, %v1615_v16  ;;  %v1617_v42 = vmov 0.0   ;;  %s274_s18 = scalar_lea.vmem [#allocation10], %s1749_s20 }
  0x31   : > { %1271 = vmatpush.xpose.msk.msra.mxu1 %vm337_vm0, %v357_v5  ;;  %v356_v7 = vld [vmem:[%s264_s26 + $0x10] sm:$0xff]  ;;  %v350_v9 = vld [vmem:[%s1753_s16 + $0x20] sm:$0xff]  ;;  %v351_v12 = vld [vmem:[%s1753_s16 + $0x28] sm:$0xff]  ;;  %323 = vst.msk [vmem:[#allocation2 + $0x10] sm:$0xff] %vm320_vm1, %v1615_v16  ;;  %1386 = vset.pattern.permute.xlu1 %v1616_v41  ;;  %s1946_s24 = scalar_lea.vmem [#allocation11], %s1749_s20  ;;  %s1304_s29 = sshll.u32 %s1603_s15, 6 }
  0x32   : > { %v352_v10 = vld [vmem:[%s1753_s16 + $0x30] sm:$0xff]  ;;  %v347_v13 = vld [vmem:[%s1753_s16 + $0x8] sm:$0xff]  ;;  %v353_v14 = vld [vmem:[%s1753_s16 + $0x38] sm:$0xff]  ;;  %324 = vst.msk [vmem:[#allocation2 + $0x18] sm:$0xff] %vm320_vm1, %v1615_v16  ;;  %1384 = vset.pattern.permute.xlu2 %v1616_v41  ;;  %1385 = vset.pattern.permute.xlu0 %v1616_v41  ;;  %s1103_s19 = scalar_lea.hbm %s2032_s3, %s1304_s29  ;;  %s1104_s21 = sshll.u32 %s1946_s24, 4  ;;  %s1105_s21 = int_to_ptr.vmem [resolvable:$true] %s1104_s21 }
  0x33   : > { %1268 = vmatpush.xpose.msk.msra.mxu0 %vm337_vm0, %v354_v2  ;;  %v348_v11 = vld [vmem:[%s1753_s16 + $0x10] sm:$0xff]  ;;  %v349_v15 = vld [vmem:[%s1753_s16 + $0x18] sm:$0xff]  ;;  %325 = vst.msk [vmem:[#allocation2 + $0x20] sm:$0xff] %vm320_vm1, %v1615_v16  ;;  %s1106_s15 = sshll.u32 %s1103_s19, 4  ;;  %s1089_s22 = scalar_lea.sflag [#allocation7], %s1746_s1  ;;  %s1107_s15 = int_to_ptr.hbm [resolvable:$true] %s1106_s15 }
  0x34   : > { %1276 = vmatpush.xpose.msk.msra.mxu2 %vm337_vm0, %v358_v3  ;;  %1280 = vmatpush.xpose.msk.msra.mxu3 %vm337_vm0, %v360_v6  ;;  %326 = vst.msk [vmem:[#allocation2 + $0x28] sm:$0xff] %vm320_vm1, %v1615_v16  ;;  %s1539_s23 = sshra.s32 %s1107_s15, 4  ;;  %s1545_s10 = scalar_lea.hbm %s2032_s3, 128  ;;  %s1540_s23 = int_to_ptr.hbm [resolvable:$true] %s1539_s23 }
  0x35   : > { %1272 = vmatpush.xpose.msk.msra.mxu1 %vm337_vm0, %v356_v7  ;;  %327 = vst.msk [vmem:[#allocation2 + $0x30] sm:$0xff] %vm320_vm1, %v1615_v16  ;;  %s1541_s6 = scalar_lea.hbm %s1540_s23, 64  ;;  %p1546_p7 = scmp.lt.s32.totalorder %s1540_s23, %s2032_s3 }
  0x36   : > { %1269 = vmatmul.msk.f32.vlgmr.msra.gmra.mxu0 %vm337_vm0, %v346_v8  ;;  %328 = vst.msk [vmem:[#allocation2 + $0x38] sm:$0xff] %vm320_vm1, %v1615_v16  ;;  %v511_v43 = vld [vmem:[#allocation2] sm:$0xff]  ;;  %p1542_p4 = scmp.ne.s32.totalorder %s1540_s23, %s1541_s6  ;;  %p1547_p8 = scmp.lt.s32.totalorder %s1545_s10, %s1541_s6 }
  0x37   : > { %1277 = vmatmul.msk.f32.vlgmr.msra.gmra.mxu2 %vm337_vm0, %v350_v9  ;;  %1281 = vmatmul.msk.f32.vlgmr.msra.gmra.mxu3 %vm337_vm0, %v352_v10  ;;  %339 = vst.msk [vmem:[#allocation4 + $0x8] sm:$0xff] %vm337_vm0, %v1617_v42  ;;  %v512_v1 = vld [vmem:[#allocation2 + $0x8] sm:$0xff] }
  0x38   : > { %1273 = vmatmul.msk.f32.vlgmr.msra.gmra.mxu1 %vm337_vm0, %v348_v11  ;;  %329 = vst.msk [vmem:[#allocation3] sm:$0xff] %vm320_vm1, %v1617_v42  ;;  %v513_v48 = vld [vmem:[#allocation2 + $0x10] sm:$0xff]  ;;  %p1543_p5 = pnand %p1542_p4, %p1695_p9  ;;  %p1548_p10 = por %p1547_p8, %p1546_p7 }
  0x39   : > { %330 = vst.msk [vmem:[#allocation3 + $0x8] sm:$0xff] %vm320_vm1, %v1617_v42  ;;  %v514_v58 = vld [vmem:[#allocation2 + $0x18] sm:$0xff] }
  0x3a   : > { %331 = vst.msk [vmem:[#allocation3 + $0x10] sm:$0xff] %vm320_vm1, %v1617_v42  ;;  %v515_v46 = vld [vmem:[#allocation2 + $0x20] sm:$0xff]  ;;  %p1544_p6 = pneg %p1543_p5 }
  0x3b   : > { %332 = vst.msk [vmem:[#allocation3 + $0x18] sm:$0xff] %vm320_vm1, %v1617_v42  ;;  %v516_v54 = vld [vmem:[#allocation2 + $0x28] sm:$0xff] }
  0x3c   : > { %333 = vst.msk [vmem:[#allocation3 + $0x20] sm:$0xff] %vm320_vm1, %v1617_v42  ;;  %v517_v53 = vld [vmem:[#allocation2 + $0x30] sm:$0xff]  ;;  %p1549_p13 = pnand %p1548_p10, %p1544_p6 }
  0x3d   : > { %334 = vst.msk [vmem:[#allocation3 + $0x28] sm:$0xff] %vm320_vm1, %v1617_v42  ;;  %v1851_v0 = vld [vmem:[#allocation2 + $0x38] sm:$0xff] }
  0x3e   : > { %1270 = vmatmul.msk.f32.gmra.mxu0 %vm337_vm0, %v347_v13  ;;  %335 = vst.msk [vmem:[#allocation3 + $0x30] sm:$0xff] %vm320_vm1, %v1617_v42 }
  0x3f   : > { %1278 = vmatmul.msk.f32.gmra.mxu2 %vm337_vm0, %v351_v12  ;;  %1282 = vmatmul.msk.f32.gmra.mxu3 %vm337_vm0, %v353_v14  ;;  %336 = vst.msk [vmem:[#allocation3 + $0x38] sm:$0xff] %vm320_vm1, %v1617_v42 }
  0x40   : > { %1274 = vmatmul.msk.f32.gmra.mxu1 %vm337_vm0, %v349_v15  ;;  %338 = vst.msk [vmem:[#allocation4] sm:$0xff] %vm337_vm0, %v1617_v42 }
  0x41   : > { %340 = vst.msk [vmem:[#allocation4 + $0x10] sm:$0xff] %vm337_vm0, %v1617_v42 }
  0x42   : > { %341 = vst.msk [vmem:[#allocation4 + $0x18] sm:$0xff] %vm337_vm0, %v1617_v42 }
  0x43   : > { %342 = vst.msk [vmem:[#allocation4 + $0x20] sm:$0xff] %vm337_vm0, %v1617_v42 }
  0x44   : > { %343 = vst.msk [vmem:[#allocation4 + $0x28] sm:$0xff] %vm337_vm0, %v1617_v42 }
  0x45   : > { %344 = vst.msk [vmem:[#allocation4 + $0x30] sm:$0xff] %vm337_vm0, %v1617_v42 }
  0x46   : > { %345 = vst.msk [vmem:[#allocation4 + $0x38] sm:$0xff] %vm337_vm0, %v1617_v42 }
  0xb3   : > { %v392_v17 = vpop.f32.mrf.mxu0 }
  0xb4   : > { %v1795_v18 = vmul.f32 0.17677669, %v392_v17 }
  0xb5   : > { %v427_v19 = vpop.f32.mrf.mxu1 }
  0xb6   : > { %v520_v20 = vsel %vm519_vm2, %v1795_v18, -inf  ;;  %v1801_v21 = vmul.f32 0.17677669, %v427_v19 }
  0xb7   : > { %521 = vmax.xlane.f32.xlu1 %v520_v20 }
  0xb8   : > { %v526_v26 = vsel %vm519_vm2, %v1801_v21, -inf }
  0xba   : > { %v462_v22 = vpop.f32.mrf.mxu2  ;;  %v497_v24 = vpop.f32.mrf.mxu3 }
  0xbb   : > { %v1803_v23 = vmul.f32 0.17677669, %v462_v22  ;;  %v1809_v28 = vmul.f32 0.17677669, %v497_v24  ;;  %v395_v34 = vpop.f32.mrf.mxu0 }
  0xbc   : > { %v1823_v38 = vmul.f32 0.17677669, %v395_v34  ;;  %v699_v34 = vld [vmem:[%s274_s18 + $0x10] sm:$0xff] }
  0xbd   : > { %v532_v25 = vsel %vm519_vm2, %v1803_v23, -inf  ;;  %v430_v27 = vpop.f32.mrf.mxu1  ;;  %v538_v32 = vsel %vm519_vm2, %v1809_v28, -inf }
  0xbe   : > { %533 = vmax.xlane.f32.xlu0 %v532_v25  ;;  %v1811_v29 = vmul.f32 0.17677669, %v430_v27  ;;  %v523_v40 = vsel %vm519_vm2, %v1823_v38, -inf }
  0xbf   : > { %527 = vmax.xlane.f32.xlu1 %v526_v26 }
  0xc0   : > { %v529_v36 = vsel %vm519_vm2, %v1811_v29, -inf }
  0xc2   : > { %v465_v30 = vpop.f32.mrf.mxu2  ;;  %v500_v33 = vpop.f32.mrf.mxu3 }
  0xc3   : > { %v1813_v31 = vmul.f32 0.17677669, %v465_v30  ;;  %v1821_v37 = vmul.f32 0.17677669, %v500_v33  ;;  %v702_v30 = vld [vmem:[%s274_s18 + $0x28] sm:$0xff]  ;;  %v700_v33 = vld [vmem:[%s274_s18 + $0x18] sm:$0xff] }
  0xc4   : > { %783 = vmatpush.msrb.mxu2 %v702_v30  ;;  %754 = vmatpush.msrb.mxu1 %v700_v33 }
  0xc5   : > { %v535_v35 = vsel %vm519_vm2, %v1813_v31, -inf  ;;  %v541_v39 = vsel %vm519_vm2, %v1821_v37, -inf }
  0xc6   : > { %539 = vmax.xlane.f32.xlu0 %v538_v32  ;;  %536 = vmax.xlane.f32.xlu2 %v535_v35  ;;  %v701_v32 = vld [vmem:[%s274_s18 + $0x20] sm:$0xff]  ;;  %v698_v35 = vld [vmem:[%s274_s18 + $0x8] sm:$0xff] }
  0xc7   : > { %530 = vmax.xlane.f32.xlu1 %v529_v36  ;;  %784 = vmatpush.msrb.mxu2 %v701_v32  ;;  %v697_v36 = vld [vmem:[%s274_s18] sm:$0xff] }
  0xc8   : > { %755 = vmatpush.msrb.mxu1 %v699_v34  ;;  %725 = vmatpush.msrb.mxu0 %v698_v35  ;;  %v825_v34 = vld [vmem:[#allocation4 + $0x20] sm:$0xff]  ;;  %v645_v35 = vld [vmem:[#allocation3 + $0x28] sm:$0xff] }
  0xca   : > { %726 = vmatpush.msrb.mxu0 %v697_v36  ;;  %v823_v36 = vld [vmem:[#allocation4 + $0x10] sm:$0xff] }
  0xce   : > { %542 = vmax.xlane.f32.xlu2 %v541_v39  ;;  %524 = vmax.xlane.f32.xlu0 %v523_v40 }
 0x12a   : > { %v522_v44 = vpop.xlane.xlu1 %521 }
 0x12b   : > { %v544_v45 = vmax.f32 %v511_v43, %v522_v44  ;;  %v704_v44 = vld [vmem:[%s274_s18 + $0x38] sm:$0xff] }
 0x12c   : > { %812 = vmatpush.msrb.mxu3 %v704_v44 }
 0x12d   : > { %893 = vst.msk [vmem:[#allocation2] sm:$0xff] %vm320_vm1, %v544_v45  ;;  %578 = vperm.xlu1 %1386, %v544_v45   ;;  %v552_v10 = vsub.f32 %v511_v43, %v544_v45 }
 0x12f   : > { %v560_v12 = vmul.f32 1.442695, %v552_v10 }
 0x131   : > { %v534_v47 = vpop.xlane.xlu0 %533 }
 0x132   : > { %v548_v49 = vmax.f32 %v515_v46, %v534_v47  ;;  %v528_v50 = vpop.xlane.xlu1 %527  ;;  %v703_v47 = vld [vmem:[%s274_s18 + $0x30] sm:$0xff] }
 0x133   : > { %v546_v51 = vmax.f32 %v513_v48, %v528_v50  ;;  %813 = vmatpush.msrb.mxu3 %v703_v47 }
 0x134   : > { %897 = vst.msk [vmem:[#allocation2 + $0x20] sm:$0xff] %vm320_vm1, %v548_v49  ;;  %598 = vperm.xlu2 %1384, %v548_v49   ;;  %v556_v63 = vsub.f32 %v515_v46, %v548_v49 }
 0x135   : > { %v554_v52 = vsub.f32 %v513_v48, %v546_v51  ;;  %895 = vst.msk [vmem:[#allocation2 + $0x10] sm:$0xff] %vm320_vm1, %v546_v51 }
 0x136   : > { %v568_v3 = vmul.f32 1.442695, %v556_v63 }
 0x137   : > { %v564_v55 = vmul.f32 1.442695, %v554_v52 }
 0x139   : > { %v540_v56 = vpop.xlane.xlu0 %539  ;;  %v537_v57 = vpop.xlane.xlu2 %536  ;;  %1387 = vpow2.f32 %v564_v55 }
 0x13a   : > { %v550_v59 = vmax.f32 %v517_v53, %v540_v56  ;;  %v549_v60 = vmax.f32 %v516_v54, %v537_v57  ;;  %v531_v61 = vpop.xlane.xlu1 %530  ;;  %1389 = vpow2.f32 %v568_v3 }
 0x13b   : > { %v547_v62 = vmax.f32 %v514_v58, %v531_v61 }
 0x13c   : > { %899 = vst.msk [vmem:[#allocation2 + $0x30] sm:$0xff] %vm320_vm1, %v550_v59  ;;  %608 = vperm.xlu0 %1385, %v550_v59   ;;  %588 = vperm.xlu2 %1384, %v546_v51   ;;  %v557_v14 = vsub.f32 %v516_v54, %v549_v60  ;;  %v558_v15 = vsub.f32 %v517_v53, %v550_v59 }
 0x13d   : > { %898 = vst.msk [vmem:[#allocation2 + $0x28] sm:$0xff] %vm320_vm1, %v549_v60  ;;  %v555_v22 = vsub.f32 %v514_v58, %v547_v62 }
 0x13e   : > { %896 = vst.msk [vmem:[#allocation2 + $0x18] sm:$0xff] %vm320_vm1, %v547_v62  ;;  %v570_v17 = vmul.f32 1.442695, %v557_v14  ;;  %v572_v19 = vmul.f32 1.442695, %v558_v15 }
 0x13f   : > { %v1853_v2 = vpop.eup %1387  ;;  %v566_v24 = vmul.f32 1.442695, %v555_v22  ;;  %v642_v22 = vld [vmem:[#allocation3 + $0x10] sm:$0xff] }
 0x140   : > { %v1865_v13 = vpop.eup %1389 }
 0x141   : > { %v543_v4 = vpop.xlane.xlu2 %542  ;;  %v525_v5 = vpop.xlane.xlu0 %524 }
 0x142   : > { %v1856_v6 = vmax.f32 %v1851_v0, %v543_v4  ;;  %v545_v7 = vmax.f32 %v512_v1, %v525_v5 }
 0x144   : > { %v559_v8 = vsub.f32 %v1851_v0, %v1856_v6  ;;  %900 = vst.msk [vmem:[#allocation2 + $0x38] sm:$0xff] %vm320_vm1, %v1856_v6  ;;  %603 = vperm.xlu2 %1384, %v549_v60   ;;  %841 = vperm.xlu0 %1385, %v1853_v2   ;;  %v553_v9 = vsub.f32 %v512_v1, %v545_v7  ;;  %v822_v0 = vld [vmem:[#allocation4 + $0x8] sm:$0xff] }
 0x145   : > { %613 = vperm.xlu1 %1386, %v1856_v6   ;;  %894 = vst.msk [vmem:[#allocation2 + $0x8] sm:$0xff] %vm320_vm1, %v545_v7 }
 0x146   : > { %v562_v11 = vmul.f32 1.442695, %v553_v9 }
 0x148   : > { %1391 = vpow2.f32 %v562_v11 }
 0x149   : > { %1393 = vpow2.f32 %v560_v12 }
 0x14a   : > { %1395 = vpow2.f32 %v570_v17 }
 0x14b   : > { %1397 = vpow2.f32 %v572_v19 }
 0x14c   : > { %851 = vperm.xlu0 %1385, %v1865_v13   ;;  %583 = vperm.xlu2 %1384, %v545_v7   ;;  %1399 = vpow2.f32 %v566_v24  ;;  %v650_v24 = vmul.f32 %v1853_v2, %v642_v22 }
 0x14d   : > { %593 = vperm.xlu1 %1386, %v547_v62  }
 0x14e   : > { %v1868_v16 = vpop.eup %1391 }
 0x14f   : > { %v1870_v20 = vpop.eup %1393 }
 0x150   : > { %v1874_v25 = vpop.eup %1395 }
 0x151   : > { %v1876_v26 = vpop.eup %1397 }
 0x152   : > { %v1880_v27 = vpop.eup %1399 }
 0x154   : > { %836 = vperm.xlu2 %1384, %v1868_v16  }
 0x155   : > { %831 = vperm.xlu1 %1386, %v1870_v20  }
 0x15c   : > { %856 = vperm.xlu2 %1384, %v1874_v25  }
 0x15d   : > { %861 = vperm.xlu1 %1386, %v1876_v26  }
 0x165   : > { %846 = vperm.xlu1 %1386, %v1880_v27  }
 0x18e   : > { %v599_v39 = vpop.permute.xlu2 %598 }
 0x18f   : > { %v620_v40 = vsub.f32 %v1803_v23, %v599_v39 }
 0x191   : > { %v632_v41 = vmul.f32 1.442695, %v620_v40 }
 0x193   : > { %1401 = vpow2.f32 %v632_v41  ;;  %v640_v41 = vld [vmem:[#allocation3] sm:$0xff] }
 0x194   : > { %v648_v2 = vmul.f32 %v1870_v20, %v640_v41 }
 0x196   : > { %v589_v42 = vpop.permute.xlu2 %588 }
 0x197   : > { %v618_v43 = vsub.f32 %v1801_v21, %v589_v42 }
 0x199   : > { %v1402_v45 = vpop.eup %1401  ;;  %v628_v46 = vmul.f32 1.442695, %v618_v43  ;;  %v653_v43 = vmul.f32 %v1874_v25, %v645_v35  ;;  %v644_v25 = vld [vmem:[#allocation3 + $0x20] sm:$0xff] }
 0x19a   : > { %1287 = vmatmul.msk.f32.vlgmr.msrb.gmra.mxu2 %vm519_vm2, %v1402_v45 }
 0x19b   : > { %1403 = vpow2.f32 %v628_v46 }
 0x19e   : > { %v604_v48 = vpop.permute.xlu2 %603 }
 0x19f   : > { %v621_v49 = vsub.f32 %v1813_v31, %v604_v48  ;;  %v579_v50 = vpop.permute.xlu1 %578 }
 0x1a0   : > { %v616_v52 = vsub.f32 %v1795_v18, %v579_v50 }
 0x1a1   : > { %v1404_v51 = vpop.eup %1403  ;;  %v634_v23 = vmul.f32 1.442695, %v621_v49 }
 0x1a2   : > { %1285 = vmatmul.msk.f32.vlgmr.msrb.gmra.mxu1 %vm519_vm2, %v1404_v51  ;;  %v662_v21 = vsel %vm519_vm2, %v1404_v51, 0.0  ;;  %v624_v53 = vmul.f32 1.442695, %v616_v52  ;;  %v821_v52 = vld [vmem:[#allocation4] sm:$0xff] }
 0x1a3   : > { %1405 = vpow2.f32 %v634_v23  ;;  %663 = vadd.xlane.f32.xlu1 %v662_v21  ;;  %v574_v21 = vmul.f32 1.442695, %v559_v8 }
 0x1a4   : > { %1407 = vpow2.f32 %v624_v53  ;;  %v652_v53 = vmul.f32 %v1865_v13, %v644_v25 }
 0x1a6   : > { %v584_v54 = vpop.permute.xlu2 %583 }
 0x1a7   : > { %v617_v55 = vsub.f32 %v1823_v38, %v584_v54  ;;  %v668_v38 = vsel %vm519_vm2, %v1402_v45, 0.0 }
 0x1a9   : > { %v1406_v56 = vpop.eup %1405  ;;  %v626_v57 = vmul.f32 1.442695, %v617_v55 }
 0x1aa   : > { %1288 = vmatmul.msk.f32.gmra.mxu2 %vm519_vm2, %v1406_v56  ;;  %v671_v31 = vsel %vm519_vm2, %v1406_v56, 0.0  ;;  %v1408_v58 = vpop.eup %1407 }
 0x1ab   : > { %672 = vadd.xlane.f32.xlu1 %v671_v31  ;;  %1283 = vmatmul.msk.f32.vlgmr.msrb.gmra.mxu0 %vm519_vm2, %v1408_v58  ;;  %v656_v18 = vsel %vm519_vm2, %v1408_v58, 0.0  ;;  %1409 = vpow2.f32 %v626_v57  ;;  %v826_v57 = vld [vmem:[#allocation4 + $0x28] sm:$0xff] }
 0x1ac   : > { %657 = vadd.xlane.f32.xlu0 %v656_v18 }
 0x1ae   : > { %v609_v59 = vpop.permute.xlu0 %608  ;;  %v837_v39 = vpop.permute.xlu2 %836 }
 0x1af   : > { %v622_v60 = vsub.f32 %v1809_v28, %v609_v59 }
 0x1b1   : > { %v636_v61 = vmul.f32 1.442695, %v622_v60  ;;  %v1410_v62 = vpop.eup %1409  ;;  %v646_v60 = vld [vmem:[#allocation3 + $0x30] sm:$0xff] }
 0x1b2   : > { %v659_v11 = vsel %vm519_vm2, %v1410_v62, 0.0  ;;  %v654_v8 = vmul.f32 %v1876_v26, %v646_v60 }
 0x1b3   : > { %1411 = vpow2.f32 %v636_v61  ;;  %1284 = vmatmul.msk.f32.gmra.mxu0 %vm519_vm2, %v1410_v62 }
 0x1b4   : > { %669 = vadd.xlane.f32.xlu0 %v668_v38 }
 0x1b6   : > { %v857_v20 = vpop.permute.xlu2 %856 }
 0x1b7   : > { %v614_v63 = vpop.permute.xlu1 %613  ;;  %v874_v61 = vmul.f32 %v857_v20, %v826_v57 }
 0x1b8   : > { %v623_v1 = vsub.f32 %v1821_v37, %v614_v63 }
 0x1b9   : > { %v1412_v3 = vpop.eup %1411 }
 0x1ba   : > { %v638_v4 = vmul.f32 1.442695, %v623_v1  ;;  %1289 = vmatmul.msk.f32.vlgmr.msrb.gmra.mxu3 %vm519_vm2, %v1412_v3  ;;  %v674_v5 = vsel %vm519_vm2, %v1412_v3, 0.0  ;;  %v870_v1 = vmul.f32 %v837_v39, %v822_v0 }
 0x1bb   : > { %675 = vadd.xlane.f32.xlu2 %v674_v5 }
 0x1bc   : > { %1413 = vpow2.f32 %v638_v4 }
 0x1bf   : > { %v594_v28 = vpop.permute.xlu1 %593 }
 0x1c0   : > { %v619_v7 = vsub.f32 %v1811_v29, %v594_v28  ;;  %v842_v29 = vpop.permute.xlu0 %841  ;;  %v641_v28 = vld [vmem:[#allocation3 + $0x8] sm:$0xff] }
 0x1c1   : > { %v871_v44 = vmul.f32 %v842_v29, %v823_v36  ;;  %v649_v26 = vmul.f32 %v1868_v16, %v641_v28 }
 0x1c2   : > { %v1414_v9 = vpop.eup %1413  ;;  %v630_v10 = vmul.f32 1.442695, %v619_v7  ;;  %v647_v7 = vld [vmem:[#allocation3 + $0x38] sm:$0xff] }
 0x1c3   : > { %1290 = vmatmul.msk.f32.gmra.mxu3 %vm519_vm2, %v1414_v9  ;;  %660 = vadd.xlane.f32.xlu2 %v659_v11  ;;  %v677_v37 = vsel %vm519_vm2, %v1414_v9, 0.0 }
 0x1c4   : > { %1415 = vpow2.f32 %v630_v10  ;;  %678 = vadd.xlane.f32.xlu0 %v677_v37 }
 0x1c5   : > { %1417 = vpow2.f32 %v574_v21 }
 0x1c7   : > { %v832_v15 = vpop.permute.xlu1 %831 }
 0x1c8   : > { %v852_v33 = vpop.permute.xlu0 %851  ;;  %v869_v54 = vmul.f32 %v832_v15, %v821_v52  ;;  %v643_v15 = vld [vmem:[#allocation3 + $0x18] sm:$0xff] }
 0x1c9   : > { %v873_v40 = vmul.f32 %v852_v33, %v825_v34  ;;  %v824_v34 = vld [vmem:[#allocation4 + $0x18] sm:$0xff] }
 0x1ca   : > { %v1416_v12 = vpop.eup %1415 }
 0x1cb   : > { %1286 = vmatmul.msk.f32.gmra.mxu1 %vm519_vm2, %v1416_v12  ;;  %v665_v14 = vsel %vm519_vm2, %v1416_v12, 0.0  ;;  %v1418_v63 = vpop.eup %1417 }
 0x1cc   : > { %666 = vadd.xlane.f32.xlu2 %v665_v14  ;;  %v655_v10 = vmul.f32 %v1418_v63, %v647_v7  ;;  %v827_v14 = vld [vmem:[#allocation4 + $0x30] sm:$0xff] }
 0x1cf   : > { %v1908_v17 = vpop.permute.xlu1 %861 }
 0x1d0   : > { %v875_v29 = vmul.f32 %v1908_v17, %v827_v14 }
 0x1d7   : > { %v1910_v19 = vpop.permute.xlu1 %846 }
 0x1d8   : > { %v872_v35 = vmul.f32 %v1910_v19, %v824_v34 }
 0x216   : > { %v664_v30 = vpop.xlane.xlu1 %663 }
 0x217   : > { %v682_v32 = vadd.f32 %v664_v30, %v650_v24  ;;  %v651_v30 = vmul.f32 %v1880_v27, %v643_v15 }
 0x219   : > { %691 = vst.msk [vmem:[#allocation3 + $0x10] sm:$0xff] %vm320_vm1, %v682_v32 }
 0x21d   : > { %v786_v42 = vpop.f32.mrf.mxu2 }
 0x21e   : > { %v881_v45 = vadd.f32 %v873_v40, %v786_v42  ;;  %v673_v46 = vpop.xlane.xlu1 %672 }
 0x21f   : > { %v685_v47 = vadd.f32 %v673_v46, %v653_v43  ;;  %v757_v48 = vpop.f32.mrf.mxu1  ;;  %v658_v50 = vpop.xlane.xlu0 %657 }
 0x220   : > { %889 = vst.msk [vmem:[#allocation4 + $0x20] sm:$0xff] %vm337_vm0, %v881_v45  ;;  %v879_v49 = vadd.f32 %v871_v44, %v757_v48  ;;  %v914_v51 = vld [vmem:[#allocation3 + $0x10] sm:$0xff]  ;;  %v680_v23 = vadd.f32 %v658_v50, %v648_v2 }
 0x221   : > { %694 = vst.msk [vmem:[#allocation3 + $0x28] sm:$0xff] %vm320_vm1, %v685_v47  ;;  %932 = vperm.xlu1 %1386, %v914_v51  }
 0x222   : > { %887 = vst.msk [vmem:[#allocation4 + $0x10] sm:$0xff] %vm337_vm0, %v879_v49 }
 0x223   : > { %689 = vst.msk [vmem:[#allocation3] sm:$0xff] %vm320_vm1, %v680_v23 }
 0x227   : > { %v670_v55 = vpop.xlane.xlu0 %669  ;;  %v908_v20 = vld [vmem:[#allocation4 + $0x20] sm:$0xff] }
 0x228   : > { %v917_v56 = vld [vmem:[#allocation3 + $0x28] sm:$0xff]  ;;  %v684_v31 = vadd.f32 %v670_v55, %v652_v53  ;;  %v728_v58 = vpop.f32.mrf.mxu0 }
 0x229   : > { %947 = vperm.xlu1 %1386, %v917_v56   ;;  %v877_v18 = vadd.f32 %v869_v54, %v728_v58 }
 0x22a   : > { %v912_v59 = vld [vmem:[#allocation3] sm:$0xff]  ;;  %693 = vst.msk [vmem:[#allocation3 + $0x20] sm:$0xff] %vm320_vm1, %v684_v31 }
 0x22b   : > { %922 = vperm.xlu0 %1385, %v912_v59   ;;  %885 = vst.msk [vmem:[#allocation4] sm:$0xff] %vm337_vm0, %v877_v18 }
 0x22d   : > { %v789_v6 = vpop.f32.mrf.mxu2 }
 0x22e   : > { %v882_v13 = vadd.f32 %v874_v61, %v789_v6  ;;  %v676_v62 = vpop.xlane.xlu2 %675  ;;  %v906_v6 = vld [vmem:[#allocation4 + $0x10] sm:$0xff] }
 0x22f   : > { %v686_v38 = vadd.f32 %v676_v62, %v654_v8 }
 0x230   : > { %890 = vst.msk [vmem:[#allocation4 + $0x28] sm:$0xff] %vm337_vm0, %v882_v13  ;;  %v731_v3 = vpop.f32.mrf.mxu0 }
 0x231   : > { %695 = vst.msk [vmem:[#allocation3 + $0x30] sm:$0xff] %vm320_vm1, %v686_v38  ;;  %866 = vperm.xlu1 %1386, %v1418_v63   ;;  %v878_v4 = vadd.f32 %v870_v1, %v731_v3  ;;  %v916_v5 = vld [vmem:[#allocation3 + $0x20] sm:$0xff]  ;;  %v828_v38 = vld [vmem:[#allocation4 + $0x38] sm:$0xff] }
 0x232   : > { %942 = vperm.xlu2 %1384, %v916_v5  }
 0x233   : > { %886 = vst.msk [vmem:[#allocation4 + $0x8] sm:$0xff] %vm337_vm0, %v878_v4 }
 0x236   : > { %v661_v9 = vpop.xlane.xlu2 %660 }
 0x237   : > { %v681_v11 = vadd.f32 %v661_v9, %v649_v26  ;;  %v679_v37 = vpop.xlane.xlu0 %678 }
 0x238   : > { %v687_v12 = vadd.f32 %v679_v37, %v655_v10  ;;  %v918_v27 = vld [vmem:[#allocation3 + $0x30] sm:$0xff] }
 0x239   : > { %690 = vst.msk [vmem:[#allocation3 + $0x8] sm:$0xff] %vm320_vm1, %v681_v11 }
 0x23a   : > { %696 = vst.msk [vmem:[#allocation3 + $0x38] sm:$0xff] %vm320_vm1, %v687_v12 }
 0x23d   : > { %v815_v22 = vpop.f32.mrf.mxu3 }
 0x23e   : > { %v883_v24 = vadd.f32 %v875_v29, %v815_v22 }
 0x23f   : > { %v667_v32 = vpop.xlane.xlu2 %666 }
 0x240   : > { %891 = vst.msk [vmem:[#allocation4 + $0x30] sm:$0xff] %vm337_vm0, %v883_v24  ;;  %v683_v16 = vadd.f32 %v667_v32, %v651_v30  ;;  %v913_v33 = vld [vmem:[#allocation3 + $0x8] sm:$0xff] }
 0x241   : > { %927 = vperm.xlu2 %1384, %v913_v33   ;;  %v919_v39 = vld [vmem:[#allocation3 + $0x38] sm:$0xff] }
 0x242   : > { %692 = vst.msk [vmem:[#allocation3 + $0x18] sm:$0xff] %vm320_vm1, %v683_v16 }
 0x246   : > { %v818_v37 = vpop.f32.mrf.mxu3 }
 0x248   : > { %v760_v36 = vpop.f32.mrf.mxu1 }
 0x249   : > { %v880_v40 = vadd.f32 %v872_v35, %v760_v36  ;;  %957 = vperm.xlu2 %1384, %v919_v39   ;;  %v915_v17 = vld [vmem:[#allocation3 + $0x18] sm:$0xff] }
 0x24a   : > { %937 = vperm.xlu0 %1385, %v915_v17  }
 0x24b   : > { %888 = vst.msk [vmem:[#allocation4 + $0x18] sm:$0xff] %vm337_vm0, %v880_v40  ;;  %v905_v40 = vld [vmem:[#allocation4 + $0x8] sm:$0xff] }
 0x252   : > { %952 = vperm.xlu0 %1385, %v918_v27  }
 0x28c   : > { %v943_v41 = vpop.permute.xlu2 %942 }
 0x28d   : > { %1419 = vrcp.f32 %v943_v41  ;;  %v1031_v46 = vand.u32 2147483648, %v943_v41  ;;  %v1029_v19 = vand.u32 2147483647, %v943_v41  ;;  %vm1025_vm4 = vweird.f32 %v943_v41 }
 0x28f   : > { %v1032_v23 = vor.u32 1.1754944e-38, %v1031_v46  ;;  %vm1030_vm6 = vcmp.eq.f32.partialorder %v1029_v19, 8.507059e+37 }
 0x293   : > { %v933_v42 = vpop.permute.xlu1 %932  ;;  %v1420_v43 = vpop.eup %1419 }
 0x294   : > { %1421 = vrcp.f32 %v933_v42  ;;  %v1021_v44 = vmul.f32 %v1420_v43, %v943_v41  ;;  %vm1026_vm3 = vweird.f32 %v1420_v43  ;;  %v999_v54 = vand.u32 2147483647, %v933_v42 }
 0x295   : > { %vm1027_vm5 = vmor %vm1025_vm4, %vm1026_vm3  ;;  %v1001_v55 = vand.u32 2147483648, %v933_v42  ;;  %vm995_vm8 = vweird.f32 %v933_v42 }
 0x296   : > { %v1022_v45 = vsub.f32 1.0, %v1021_v44  ;;  %vm1000_vm10 = vcmp.eq.f32.partialorder %v999_v54, 8.507059e+37 }
 0x297   : > { %v1002_v18 = vor.u32 1.1754944e-38, %v1001_v55 }
 0x298   : > { %v1023_v47 = vmul.f32 %v1420_v43, %v1022_v45 }
 0x29a   : > { %v1422_v48 = vpop.eup %1421  ;;  %v1024_v2 = vadd.f32 %v1420_v43, %v1023_v47 }
 0x29b   : > { %v991_v49 = vmul.f32 %v1422_v48, %v933_v42  ;;  %v928_v50 = vpop.permute.xlu2 %927  ;;  %v1939_v51 = vpop.permute.xlu1 %947  ;;  %vm996_vm7 = vweird.f32 %v1422_v48 }
 0x29c   : > { %1423 = vrcp.f32 %v928_v50  ;;  %v1028_v25 = vsel %vm1027_vm5, %v1420_v43, %v1024_v2  ;;  %vm997_vm9 = vmor %vm995_vm8, %vm996_vm7  ;;  %v984_v13 = vand.u32 2147483647, %v928_v50  ;;  %vm980_vm11 = vweird.f32 %v928_v50  ;;  %v909_v43 = vld [vmem:[#allocation4 + $0x28] sm:$0xff]  ;;  %v904_v2 = vld [vmem:[#allocation4] sm:$0xff] }
 0x29d   : > { %v992_v52 = vsub.f32 1.0, %v991_v49  ;;  %1425 = vrcp.f32 %v1939_v51  ;;  %v1942_v21 = vpop.permute.xlu0 %922  ;;  %v1033_v53 = vsel %vm1030_vm6, %v1032_v23, %v1028_v25  ;;  %v986_v5 = vand.u32 2147483648, %v928_v50 }
 0x29e   : > { %v1034_v56 = vmul.f32 %v1033_v53, %v908_v20  ;;  %1427 = vrcp.f32 %v1942_v21  ;;  %vm1040_vm12 = vweird.f32 %v1939_v51  ;;  %v1044_v7 = vand.u32 2147483647, %v1939_v51 }
 0x29f   : > { %v993_v57 = vmul.f32 %v1422_v48, %v992_v52  ;;  %v1046_v10 = vand.u32 2147483648, %v1939_v51  ;;  %vm1960_vm14 = vcmp.eq.f32.partialorder %v984_v13, 8.507059e+37  ;;  %v987_v22 = vor.u32 1.1754944e-38, %v986_v5 }
 0x2a0   : > { %1084 = vst.msk [vmem:[%s1946_s24 + $0x20] sm:$0xff] %vm337_vm0, %v1034_v56  ;;  %v971_v24 = vand.u32 2147483648, %v1942_v21  ;;  %v969_v34 = vand.u32 2147483647, %v1942_v21  ;;  %vm1045_vm4 = vcmp.eq.f32.partialorder %v1044_v7, 8.507059e+37  ;;  %vm965_vm5 = vweird.f32 %v1942_v21 }
 0x2a1   : > { %v994_v31 = vadd.f32 %v1422_v48, %v993_v57  ;;  %v1047_v36 = vor.u32 1.1754944e-38, %v1046_v10 }
 0x2a2   : > { %v1424_v58 = vpop.eup %1423  ;;  %v972_v45 = vor.u32 1.1754944e-38, %v971_v24  ;;  %vm970_vm7 = vcmp.eq.f32.partialorder %v969_v34, 8.507059e+37 }
 0x2a3   : > { %v1426_v59 = vpop.eup %1425  ;;  %v998_v60 = vsel %vm997_vm9, %v1422_v48, %v994_v31  ;;  %v976_v61 = vmul.f32 %v1424_v58, %v928_v50  ;;  %v1950_v0 = vpop.permute.xlu2 %957  ;;  %vm981_vm13 = vweird.f32 %v1424_v58 }
 0x2a4   : > { %v1003_v8 = vsel %vm1000_vm10, %v1002_v18, %v998_v60  ;;  %v1036_v62 = vmul.f32 %v1426_v59, %v1939_v51  ;;  %1429 = vrcp.f32 %v1950_v0  ;;  %v867_v63 = vpop.permute.xlu1 %866  ;;  %v1428_v1 = vpop.eup %1427  ;;  %vm1041_vm15 = vweird.f32 %v1426_v59  ;;  %vm982_vm1 = vmor %vm980_vm11, %vm981_vm13 }
 0x2a5   : > { %v1004_v3 = vmul.f32 %v1003_v8, %v906_v6  ;;  %v977_v4 = vsub.f32 1.0, %v976_v61  ;;  %v961_v26 = vmul.f32 %v1428_v1, %v1942_v21  ;;  %v876_v11 = vmul.f32 %v867_v63, %v828_v38  ;;  %vm1042_vm3 = vmor %vm1040_vm12, %vm1041_vm15 }
 0x2a6   : > { %v1037_v28 = vsub.f32 1.0, %v1036_v62  ;;  %vm966_vm2 = vweird.f32 %v1428_v1  ;;  %v1076_v48 = vand.u32 2147483648, %v1950_v0  ;;  %v1074_v51 = vand.u32 2147483647, %v1950_v0  ;;  %v907_v62 = vld [vmem:[#allocation4 + $0x18] sm:$0xff] }
 0x2a7   : > { %1082 = vst.msk [vmem:[%s1946_s24 + $0x10] sm:$0xff] %vm337_vm0, %v1004_v3  ;;  %v978_v9 = vmul.f32 %v1424_v58, %v977_v4  ;;  %v962_v15 = vsub.f32 1.0, %v961_v26  ;;  %v884_v30 = vadd.f32 %v876_v11, %v818_v37  ;;  %vm967_vm6 = vmor %vm965_vm5, %vm966_vm2  ;;  %vm1070_vm9 = vweird.f32 %v1950_v0 }
 0x2a8   : > { %v1038_v14 = vmul.f32 %v1426_v59, %v1037_v28  ;;  %v1077_v52 = vor.u32 1.1754944e-38, %v1076_v48  ;;  %vm1075_vm11 = vcmp.eq.f32.partialorder %v1074_v51, 8.507059e+37 }
 0x2a9   : > { %v979_v29 = vadd.f32 %v1424_v58, %v978_v9  ;;  %v963_v33 = vmul.f32 %v1428_v1, %v962_v15  ;;  %892 = vst.msk [vmem:[#allocation4 + $0x38] sm:$0xff] %vm337_vm0, %v884_v30  ;;  %v910_v9 = vld [vmem:[#allocation4 + $0x30] sm:$0xff] }
 0x2aa   : > { %v1430_v32 = vpop.eup %1429  ;;  %v1039_v16 = vadd.f32 %v1426_v59, %v1038_v14 }
 0x2ab   : > { %v983_v35 = vsel %vm982_vm1, %v1424_v58, %v979_v29  ;;  %v1066_v39 = vmul.f32 %v1430_v32, %v1950_v0  ;;  %v964_v41 = vadd.f32 %v1428_v1, %v963_v33  ;;  %vm1071_vm8 = vweird.f32 %v1430_v32 }
 0x2ac   : > { %v988_v17 = vsel %vm1960_vm14, %v987_v22, %v983_v35  ;;  %v1043_v27 = vsel %vm1042_vm3, %v1426_v59, %v1039_v16  ;;  %vm1072_vm10 = vmor %vm1070_vm9, %vm1071_vm8 }
 0x2ad   : > { %v989_v42 = vmul.f32 %v988_v17, %v905_v40  ;;  %v1048_v44 = vsel %vm1045_vm4, %v1047_v36, %v1043_v27  ;;  %v1067_v46 = vsub.f32 1.0, %v1066_v39  ;;  %v968_v19 = vsel %vm967_vm6, %v1428_v1, %v964_v41 }
 0x2ae   : > { %v1049_v47 = vmul.f32 %v1048_v44, %v909_v43  ;;  %v973_v49 = vsel %vm970_vm7, %v972_v45, %v968_v19 }
 0x2af   : > { %1081 = vst.msk [vmem:[%s1946_s24 + $0x8] sm:$0xff] %vm337_vm0, %v989_v42  ;;  %v1068_v50 = vmul.f32 %v1430_v32, %v1067_v46  ;;  %v974_v23 = vmul.f32 %v973_v49, %v904_v2 }
 0x2b0   : > { %1085 = vst.msk [vmem:[%s1946_s24 + $0x28] sm:$0xff] %vm337_vm0, %v1049_v47  ;;  %v911_v53 = vld [vmem:[#allocation4 + $0x38] sm:$0xff] }
 0x2b1   : > { %v1069_v25 = vadd.f32 %v1430_v32, %v1068_v50  ;;  %1080 = vst.msk [vmem:[%s1946_s24] sm:$0xff] %vm337_vm0, %v974_v23 }
 0x2b3   : > { %v1073_v21 = vsel %vm1072_vm10, %v1430_v32, %v1069_v25 }
 0x2b4   : > { %v1078_v20 = vsel %vm1075_vm11, %v1077_v52, %v1073_v21 }
 0x2b5   : > { %v1079_v54 = vmul.f32 %v1078_v20, %v911_v53 }
 0x2b7   : > { %1087 = vst.msk [vmem:[%s1946_s24 + $0x38] sm:$0xff] %vm337_vm0, %v1079_v54 }
 0x2bc   : > { %v938_v55 = vpop.permute.xlu0 %937 }
 0x2bd   : > { %1431 = vrcp.f32 %v938_v55  ;;  %v1016_v18 = vand.u32 2147483648, %v938_v55  ;;  %v1014_v60 = vand.u32 2147483647, %v938_v55  ;;  %vm1010_vm13 = vweird.f32 %v938_v55 }
 0x2bf   : > { %v1017_v6 = vor.u32 1.1754944e-38, %v1016_v18  ;;  %vm1015_vm15 = vcmp.eq.f32.partialorder %v1014_v60, 8.507059e+37 }
 0x2c3   : > { %v1432_v56 = vpop.eup %1431 }
 0x2c4   : > { %v1006_v57 = vmul.f32 %v1432_v56, %v938_v55  ;;  %v953_v31 = vpop.permute.xlu0 %952  ;;  %vm1011_vm12 = vweird.f32 %v1432_v56 }
 0x2c5   : > { %1433 = vrcp.f32 %v953_v31  ;;  %vm1012_vm14 = vmor %vm1010_vm13, %vm1011_vm12  ;;  %v1061_v3 = vand.u32 2147483648, %v953_v31  ;;  %v1059_v5 = vand.u32 2147483647, %v953_v31  ;;  %vm1055_vm2 = vweird.f32 %v953_v31 }
 0x2c6   : > { %v1007_v58 = vsub.f32 1.0, %v1006_v57 }
 0x2c7   : > { %v1062_v7 = vor.u32 1.1754944e-38, %v1061_v3  ;;  %vm1060_vm4 = vcmp.eq.f32.partialorder %v1059_v5, 8.507059e+37 }
 0x2c8   : > { %v1008_v59 = vmul.f32 %v1432_v56, %v1007_v58 }
 0x2ca   : > { %v1009_v61 = vadd.f32 %v1432_v56, %v1008_v59 }
 0x2cb   : > { %v1434_v0 = vpop.eup %1433 }
 0x2cc   : > { %v1013_v8 = vsel %vm1012_vm14, %v1432_v56, %v1009_v61  ;;  %v1051_v13 = vmul.f32 %v1434_v0, %v953_v31  ;;  %vm1056_vm1 = vweird.f32 %v1434_v0 }
 0x2cd   : > { %v1018_v38 = vsel %vm1015_vm15, %v1017_v6, %v1013_v8  ;;  %vm1057_vm3 = vmor %vm1055_vm2, %vm1056_vm1 }
 0x2ce   : > { %v1019_v63 = vmul.f32 %v1018_v38, %v907_v62  ;;  %v1052_v1 = vsub.f32 1.0, %v1051_v13 }
 0x2d0   : > { %1083 = vst.msk [vmem:[%s1946_s24 + $0x18] sm:$0xff] %vm337_vm0, %v1019_v63  ;;  %v1053_v4 = vmul.f32 %v1434_v0, %v1052_v1 }
 0x2d2   : > { %v1054_v28 = vadd.f32 %v1434_v0, %v1053_v4 }
 0x2d4   : > { %v1058_v26 = vsel %vm1057_vm3, %v1434_v0, %v1054_v28 }
 0x2d5   : > { %v1063_v10 = vsel %vm1060_vm4, %v1062_v7, %v1058_v26 }
 0x2d6   : > { %v1064_v11 = vmul.f32 %v1063_v10, %v910_v9 }
 0x2d8   : > { %1086 = vst.msk [vmem:[%s1946_s24 + $0x30] sm:$0xff] %vm337_vm0, %v1064_v11 }
 0x2d9   : > { %1552 = shalt.err (!%p1549_p13)
}
 0x2da   : > { %s1618_s11 = smov 128   ;;  %s1619_s1 = smov 8  }
 0x2db   : > { %1311 = dma.vmem_to_hbm [thread:$0]  (%p1695_p9), %s1105_s21, 1024, %s1107_s15, %s1089_s22, %s1618_s11, %s1618_s11, %s1619_s1  }
 0x2dc PF: > { %s2053_s20 = sld [smem:[#allocation17_spill]]  ;;  %s1121_s28 = sand.u32 1, %s1591_s12  }
 0x2dd   : > { %p1324_p0 = pnand %p1249_p12, %p1702_p11  ;;  %s1122_s16 = scalar_lea.sflag [#allocation7], %s1121_s28 }
 0x2df   : > { %p1325_p1 = pneg %p1324_p0 }
 0x2e1   : > { %1586 = dma.done.wait (%p1325_p1), %s1122_s16, 1024  }
 0x2e2   : > { %1588 = vsyncadd (%p1325_p1), %s1122_s16, 4294966272  ;;  %s22_s17 = sadd.s32 1, %s2053_s20   ;;  %s2054_s14 = sld [smem:[#allocation15_spill]] }
 0x2e3   : > { %p19_p2 = scmp.ge.s32.totalorder %s22_s17, 4   ;;  %s2055_s26 = sld [smem:[#allocation19_spill]] }
 0x2e4   : > { %s2056_s15 = sld [smem:[#allocation16_spill]]  ;;  %s2058_s12 = smov %s1595_s13 }
 0x2e5   : > { %s2057_s16 = sld [smem:[#allocation18_spill]]  ;;  %21 = sbr.rel (!%p19_p2) target bundleno = 10 (0xa), region = 109 }
 0x2e8   : > { %s2059_s13 = smov %s2054_s14 }
 0x2e9   : > { %s2060_s14 = smov %s2055_s26 }
 0x2ea   :  { %1128 = vsyncpa [#allocation6], 1 }
 0x2eb   :  { %1130 = vsyncpa [#allocation6 + $0x1], 1 }
 0x2ec   :  { %1131 = vsyncpa [#allocation9], 1 }
 0x2ed   :  { %1133 = vsyncpa [#allocation9 + $0x1], 1 }
 0x2ee   :  { %1134 = vsyncpa [#allocation7], 1 }
 0x2ef   :  { %1136 = vsyncpa [#allocation7 + $0x1], 1 }

</bundles_post_ra>
